<compile_context>
chip_gen: v7x
topology: tpu7x:2x2x1
jax: 0.10.0
libtpu: 0.0.40
codegen_flags: <defaults>
</compile_context>

<pallas_src>
import jax
import jax.numpy as jnp
from jax.experimental import pallas as pl
from jax.experimental.pallas import tpu as pltpu


def _linear_adapter_kernel(x_ref, w1_ref, b1_ref, w2_ref, b2_ref, se_ref, o_ref):
    # fc1 + ReLU, f32 accumulation on the MXU.
    h = jnp.dot(x_ref[...], w1_ref[...], preferred_element_type=jnp.float32)
    h = jnp.maximum(h + b1_ref[...], 0.0)
    # Feed the second matmul in the fc2 weight dtype (bf16-ready), accumulate f32.
    h = h.astype(w2_ref.dtype)
    o = jnp.dot(h, w2_ref[...], preferred_element_type=jnp.float32)
    o = (o + b2_ref[...]) * se_ref[...]          # bias + channel-wise SE scale
    o_ref[...] = o.astype(o_ref.dtype)


def linear_adapter(x, w1, b1, w2, b2, se, *, block_m=256):
    """LinearAdapter forward.

    x : (M, inplanes)
    w1: (inplanes, width)   = fc1.weight.T      b1: (1, width)
    w2: (width, outplanes)  = fc2.weight.T      b2: (1, outplanes)
    se: (1, outplanes)
    returns (M, outplanes) in x.dtype
    """
    M, inplanes = x.shape
    _, width = w1.shape
    _, outplanes = w2.shape
    assert w1.shape == (inplanes, width)
    assert w2.shape == (width, outplanes)
    assert b1.shape == (1, width) and b2.shape == (1, outplanes)
    assert se.shape == (1, outplanes)

    tm = min(block_m, M)
    grid = (pl.cdiv(M, tm),)

    nbytes = lambda a: a.size * a.dtype.itemsize
    cost = pl.CostEstimate(
        flops=2 * M * inplanes * width + 2 * M * width * outplanes,
        transcendentals=0,
        bytes_accessed=(nbytes(x) + nbytes(w1) + nbytes(b1) + nbytes(w2)
                        + nbytes(b2) + nbytes(se)
                        + M * outplanes * x.dtype.itemsize),
    )

    def build(resident_pipeline_mode):
        extra = ({} if resident_pipeline_mode is None
                 else {"pipeline_mode": resident_pipeline_mode})

        def resident(shape):
            # Constant block index: fetched once, stays resident in VMEM.
            return pl.BlockSpec(shape, lambda i: (0, 0), **extra)

        return pl.pallas_call(
            _linear_adapter_kernel,
            out_shape=jax.ShapeDtypeStruct((M, outplanes), x.dtype),
            grid_spec=pltpu.PrefetchScalarGridSpec(
                num_scalar_prefetch=0,
                grid=grid,
                in_specs=[
                    pl.BlockSpec((tm, inplanes), lambda i: (i, 0)),  # x tile
                    resident((inplanes, width)),                     # W1
                    resident((1, width)),                            # b1
                    resident((width, outplanes)),                    # W2
                    resident((1, outplanes)),                        # b2
                    resident((1, outplanes)),                        # se
                ],
                out_specs=pl.BlockSpec((tm, outplanes), lambda i: (i, 0)),
            ),
            compiler_params=pltpu.CompilerParams(
                dimension_semantics=("parallel",),   # megacore on v7x
                vmem_limit_bytes=64 << 20,
            ),
            cost_estimate=cost,
        )

    try:
        # Single-buffer the resident operands (block index never changes) —
        # halves their VMEM footprint, which matters most on v7x (64 MiB).
        return build(pl.Buffered(1))(x, w1, b1, w2, b2, se)
    except Exception:
        # Fallback if this JAX build rejects BlockSpec(pipeline_mode=...):
        # default 2-deep buffering, still correct.
        return build(None)(x, w1, b1, w2, b2, se)


def reference(x, w1, b1, w2, b2, se):
    h = jnp.maximum(x @ w1 + b1, 0.0)
    return (h @ w2 + b2) * se


if __name__ == "__main__":
    # Small shapes implied by the module: tokens = batch*seq, hidden = 32,
    # peft_ratio = 4 -> bottleneck width = 8.
    batch, seq = 2, 8
    inplanes, outplanes, peft_ratio = 32, 32, 4
    width = int(min(inplanes, outplanes) // peft_ratio)

    key = jax.random.PRNGKey(0)
    kx, kw1, kb1, kw2, kb2, kse = jax.random.split(key, 6)

    x3 = jax.random.normal(kx, (batch, seq, inplanes), dtype=jnp.float32)
    x = x3.reshape(batch * seq, inplanes)

    # Linear params stored pre-transposed as (in, out) = W.T.
    w1 = jax.random.normal(kw1, (inplanes, width), dtype=jnp.float32) * 0.05
    b1 = jax.random.normal(kb1, (1, width), dtype=jnp.float32) * 0.01
    w2 = jax.random.normal(kw2, (width, outplanes), dtype=jnp.float32) * 0.05
    b2 = jax.random.normal(kb2, (1, outplanes), dtype=jnp.float32) * 0.01
    # The module initializes se to zeros (which would zero the output); use a
    # nonzero value so the full data path is exercised.
    se = jax.random.normal(kse, (1, outplanes), dtype=jnp.float32)

    out = jax.block_until_ready(linear_adapter(x, w1, b1, w2, b2, se))
    ref = reference(x, w1, b1, w2, b2, se)

    assert out.shape == (batch * seq, outplanes)
    assert jnp.allclose(out, ref, atol=1e-5, rtol=1e-5), "mismatch vs reference"

    _ = out.reshape(batch, seq, outplanes)  # restore (batch, seq, outplanes)
    print("KERNEL_OK")
</pallas_src>

<mosaic_0001>
module attributes {stable_mosaic.version = 11 : i64} {
  func.func @_linear_adapter_kernel(%arg0: i32, %arg1: memref<16x32xf32, #tpu.memory_space<vmem>>, %arg2: memref<32x8xf32, #tpu.memory_space<vmem>>, %arg3: memref<1x8xf32, #tpu.memory_space<vmem>>, %arg4: memref<8x32xf32, #tpu.memory_space<vmem>>, %arg5: memref<1x32xf32, #tpu.memory_space<vmem>>, %arg6: memref<1x32xf32, #tpu.memory_space<vmem>>, %arg7: memref<16x32xf32, #tpu.memory_space<vmem>>) attributes {dimension_semantics = [#tpu.dimension_semantics<parallel>], iteration_bounds = array<i64: 1>, scalar_prefetch = 0 : i64, scratch_operands = 0 : i64, tpu.core_type = #tpu.core_type<tc>, window_params = [{transform_indices = @transform_0, window_bounds = array<i64: 16, 32>}, {pipeline_mode = #tpu.pipeline_mode<synchronous>, transform_indices = @transform_1, window_bounds = array<i64: 32, 8>}, {pipeline_mode = #tpu.pipeline_mode<synchronous>, transform_indices = @transform_2, window_bounds = array<i64: 1, 8>}, {pipeline_mode = #tpu.pipeline_mode<synchronous>, transform_indices = @transform_3, window_bounds = array<i64: 8, 32>}, {pipeline_mode = #tpu.pipeline_mode<synchronous>, transform_indices = @transform_4, window_bounds = array<i64: 1, 32>}, {pipeline_mode = #tpu.pipeline_mode<synchronous>, transform_indices = @transform_5, window_bounds = array<i64: 1, 32>}, {transform_indices = @transform_6, window_bounds = array<i64: 16, 32>}]} {
    %c0 = arith.constant 0 : index
    %c0_0 = arith.constant 0 : index
    %0 = vector.load %arg1[%c0, %c0_0] : memref<16x32xf32, #tpu.memory_space<vmem>>, vector<16x32xf32>
    %c0_1 = arith.constant 0 : index
    %c0_2 = arith.constant 0 : index
    %1 = vector.load %arg2[%c0_1, %c0_2] : memref<32x8xf32, #tpu.memory_space<vmem>>, vector<32x8xf32>
    %cst = arith.constant dense<0.000000e+00> : vector<16x8xf32>
    %2 = tpu.matmul %0, %1, %cst {dimension_numbers = #tpu.dot_dimension_numbers<[1], [0], [0], [1], [0, 0, 1, 1], [], []>} : vector<16x32xf32>, vector<32x8xf32>, vector<16x8xf32> -> vector<16x8xf32>
    %c0_3 = arith.constant 0 : index
    %c0_4 = arith.constant 0 : index
    %3 = vector.load %arg3[%c0_3, %c0_4] : memref<1x8xf32, #tpu.memory_space<vmem>>, vector<1x8xf32>
    %4 = vector.broadcast %3 : vector<1x8xf32> to vector<16x8xf32>
    %5 = arith.addf %2, %4 : vector<16x8xf32>
    %cst_5 = arith.constant 0.000000e+00 : f32
    %6 = vector.broadcast %cst_5 : f32 to vector<16x8xf32>
    %7 = arith.maximumf %5, %6 : vector<16x8xf32>
    %c0_6 = arith.constant 0 : index
    %c0_7 = arith.constant 0 : index
    %8 = vector.load %arg4[%c0_6, %c0_7] : memref<8x32xf32, #tpu.memory_space<vmem>>, vector<8x32xf32>
    %cst_8 = arith.constant dense<0.000000e+00> : vector<16x32xf32>
    %9 = tpu.matmul %7, %8, %cst_8 {dimension_numbers = #tpu.dot_dimension_numbers<[1], [0], [0], [1], [0, 0, 1, 1], [], []>} : vector<16x8xf32>, vector<8x32xf32>, vector<16x32xf32> -> vector<16x32xf32>
    %c0_9 = arith.constant 0 : index
    %c0_10 = arith.constant 0 : index
    %10 = vector.load %arg5[%c0_9, %c0_10] : memref<1x32xf32, #tpu.memory_space<vmem>>, vector<1x32xf32>
    %11 = vector.broadcast %10 : vector<1x32xf32> to vector<16x32xf32>
    %12 = arith.addf %9, %11 : vector<16x32xf32>
    %c0_11 = arith.constant 0 : index
    %c0_12 = arith.constant 0 : index
    %13 = vector.load %arg6[%c0_11, %c0_12] : memref<1x32xf32, #tpu.memory_space<vmem>>, vector<1x32xf32>
    %14 = vector.broadcast %13 : vector<1x32xf32> to vector<16x32xf32>
    %15 = arith.mulf %12, %14 : vector<16x32xf32>
    %c0_13 = arith.constant 0 : index
    %c0_14 = arith.constant 0 : index
    %16 = vector.load %arg7[%c0_13, %c0_14] : memref<16x32xf32, #tpu.memory_space<vmem>>, vector<16x32xf32>
    tpu.vector_store %arg7[%c0_13, %c0_14], %15 {strides = array<i32>} : memref<16x32xf32, #tpu.memory_space<vmem>>, vector<16x32xf32>,
    return
  }
  func.func @transform_0(%arg0: i32) -> (i32, i32) {
    %c0_i32 = arith.constant 0 : i32
    %c0_i32_0 = arith.constant 0 : i32
    return %arg0, %c0_i32 : i32, i32
  }
  func.func @transform_1(%arg0: i32) -> (i32, i32) {
    %c0_i32 = arith.constant 0 : i32
    %c0_i32_0 = arith.constant 0 : i32
    %c0_i32_1 = arith.constant 0 : i32
    return %c0_i32, %c0_i32_0 : i32, i32
  }
  func.func @transform_2(%arg0: i32) -> (i32, i32) {
    %c0_i32 = arith.constant 0 : i32
    %c0_i32_0 = arith.constant 0 : i32
    %c0_i32_1 = arith.constant 0 : i32
    return %c0_i32, %c0_i32_0 : i32, i32
  }
  func.func @transform_3(%arg0: i32) -> (i32, i32) {
    %c0_i32 = arith.constant 0 : i32
    %c0_i32_0 = arith.constant 0 : i32
    %c0_i32_1 = arith.constant 0 : i32
    return %c0_i32, %c0_i32_0 : i32, i32
  }
  func.func @transform_4(%arg0: i32) -> (i32, i32) {
    %c0_i32 = arith.constant 0 : i32
    %c0_i32_0 = arith.constant 0 : i32
    %c0_i32_1 = arith.constant 0 : i32
    return %c0_i32, %c0_i32_0 : i32, i32
  }
  func.func @transform_5(%arg0: i32) -> (i32, i32) {
    %c0_i32 = arith.constant 0 : i32
    %c0_i32_0 = arith.constant 0 : i32
    %c0_i32_1 = arith.constant 0 : i32
    return %c0_i32, %c0_i32_0 : i32, i32
  }
  func.func @transform_6(%arg0: i32) -> (i32, i32) {
    %c0_i32 = arith.constant 0 : i32
    %c0_i32_0 = arith.constant 0 : i32
    return %arg0, %c0_i32 : i32, i32
  }
}

module attributes {stable_mosaic.version = 11 : i64} {
  func.func @_linear_adapter_kernel(%arg0: i32, %arg1: memref<16x32xf32, #tpu.memory_space<vmem>>, %arg2: memref<32x8xf32, #tpu.memory_space<vmem>>, %arg3: memref<1x8xf32, #tpu.memory_space<vmem>>, %arg4: memref<8x32xf32, #tpu.memory_space<vmem>>, %arg5: memref<1x32xf32, #tpu.memory_space<vmem>>, %arg6: memref<1x32xf32, #tpu.memory_space<vmem>>, %arg7: memref<16x32xf32, #tpu.memory_space<vmem>>) attributes {dimension_semantics = [#tpu.dimension_semantics<parallel>], iteration_bounds = array<i64: 1>, scalar_prefetch = 0 : i64, scratch_operands = 0 : i64, tpu.core_type = #tpu.core_type<tc>, window_params = [{transform_indices = @transform_0, window_bounds = array<i64: 16, 32>}, {pipeline_mode = #tpu.pipeline_mode<synchronous>, transform_indices = @transform_1, window_bounds = array<i64: 32, 8>}, {pipeline_mode = #tpu.pipeline_mode<synchronous>, transform_indices = @transform_2, window_bounds = array<i64: 1, 8>}, {pipeline_mode = #tpu.pipeline_mode<synchronous>, transform_indices = @transform_3, window_bounds = array<i64: 8, 32>}, {pipeline_mode = #tpu.pipeline_mode<synchronous>, transform_indices = @transform_4, window_bounds = array<i64: 1, 32>}, {pipeline_mode = #tpu.pipeline_mode<synchronous>, transform_indices = @transform_5, window_bounds = array<i64: 1, 32>}, {transform_indices = @transform_6, window_bounds = array<i64: 16, 32>}]} {
    %c0 = arith.constant 0 : index
    %c0_0 = arith.constant 0 : index
    %0 = vector.load %arg1[%c0, %c0_0] : memref<16x32xf32, #tpu.memory_space<vmem>>, vector<16x32xf32>
    %c0_1 = arith.constant 0 : index
    %c0_2 = arith.constant 0 : index
    %1 = vector.load %arg2[%c0_1, %c0_2] : memref<32x8xf32, #tpu.memory_space<vmem>>, vector<32x8xf32>
    %cst = arith.constant dense<0.000000e+00> : vector<16x8xf32>
    %2 = tpu.matmul %0, %1, %cst {dimension_numbers = #tpu.dot_dimension_numbers<[1], [0], [0], [1], [0, 0, 1, 1], [], []>} : vector<16x32xf32>, vector<32x8xf32>, vector<16x8xf32> -> vector<16x8xf32>
    %c0_3 = arith.constant 0 : index
    %c0_4 = arith.constant 0 : index
    %3 = vector.load %arg3[%c0_3, %c0_4] : memref<1x8xf32, #tpu.memory_space<vmem>>, vector<1x8xf32>
    %4 = vector.broadcast %3 : vector<1x8xf32> to vector<16x8xf32>
    %5 = arith.addf %2, %4 : vector<16x8xf32>
    %cst_5 = arith.constant 0.000000e+00 : f32
    %6 = vector.broadcast %cst_5 : f32 to vector<16x8xf32>
    %7 = arith.maximumf %5, %6 : vector<16x8xf32>
    %c0_6 = arith.constant 0 : index
    %c0_7 = arith.constant 0 : index
    %8 = vector.load %arg4[%c0_6, %c0_7] : memref<8x32xf32, #tpu.memory_space<vmem>>, vector<8x32xf32>
    %cst_8 = arith.constant dense<0.000000e+00> : vector<16x32xf32>
    %9 = tpu.matmul %7, %8, %cst_8 {dimension_numbers = #tpu.dot_dimension_numbers<[1], [0], [0], [1], [0, 0, 1, 1], [], []>} : vector<16x8xf32>, vector<8x32xf32>, vector<16x32xf32> -> vector<16x32xf32>
    %c0_9 = arith.constant 0 : index
    %c0_10 = arith.constant 0 : index
    %10 = vector.load %arg5[%c0_9, %c0_10] : memref<1x32xf32, #tpu.memory_space<vmem>>, vector<1x32xf32>
    %11 = vector.broadcast %10 : vector<1x32xf32> to vector<16x32xf32>
    %12 = arith.addf %9, %11 : vector<16x32xf32>
    %c0_11 = arith.constant 0 : index
    %c0_12 = arith.constant 0 : index
    %13 = vector.load %arg6[%c0_11, %c0_12] : memref<1x32xf32, #tpu.memory_space<vmem>>, vector<1x32xf32>
    %14 = vector.broadcast %13 : vector<1x32xf32> to vector<16x32xf32>
    %15 = arith.mulf %12, %14 : vector<16x32xf32>
    %c0_13 = arith.constant 0 : index
    %c0_14 = arith.constant 0 : index
    %16 = vector.load %arg7[%c0_13, %c0_14] : memref<16x32xf32, #tpu.memory_space<vmem>>, vector<16x32xf32>
    tpu.vector_store %arg7[%c0_13, %c0_14], %15 {strides = array<i32>} : memref<16x32xf32, #tpu.memory_space<vmem>>, vector<16x32xf32>,
    return
  }
  func.func @transform_0(%arg0: i32) -> (i32, i32) {
    %c0_i32 = arith.constant 0 : i32
    %c0_i32_0 = arith.constant 0 : i32
    return %arg0, %c0_i32 : i32, i32
  }
  func.func @transform_1(%arg0: i32) -> (i32, i32) {
    %c0_i32 = arith.constant 0 : i32
    %c0_i32_0 = arith.constant 0 : i32
    %c0_i32_1 = arith.constant 0 : i32
    return %c0_i32, %c0_i32_0 : i32, i32
  }
  func.func @transform_2(%arg0: i32) -> (i32, i32) {
    %c0_i32 = arith.constant 0 : i32
    %c0_i32_0 = arith.constant 0 : i32
    %c0_i32_1 = arith.constant 0 : i32
    return %c0_i32, %c0_i32_0 : i32, i32
  }
  func.func @transform_3(%arg0: i32) -> (i32, i32) {
    %c0_i32 = arith.constant 0 : i32
    %c0_i32_0 = arith.constant 0 : i32
    %c0_i32_1 = arith.constant 0 : i32
    return %c0_i32, %c0_i32_0 : i32, i32
  }
  func.func @transform_4(%arg0: i32) -> (i32, i32) {
    %c0_i32 = arith.constant 0 : i32
    %c0_i32_0 = arith.constant 0 : i32
    %c0_i32_1 = arith.constant 0 : i32
    return %c0_i32, %c0_i32_0 : i32, i32
  }
  func.func @transform_5(%arg0: i32) -> (i32, i32) {
    %c0_i32 = arith.constant 0 : i32
    %c0_i32_0 = arith.constant 0 : i32
    %c0_i32_1 = arith.constant 0 : i32
    return %c0_i32, %c0_i32_0 : i32, i32
  }
  func.func @transform_6(%arg0: i32) -> (i32, i32) {
    %c0_i32 = arith.constant 0 : i32
    %c0_i32_0 = arith.constant 0 : i32
    return %arg0, %c0_i32 : i32, i32
  }
}

</mosaic_0001>

<bundles_post_ra>
// kernel: tpu_custom_call.1
= control target key start
LH: loop header
LB: loop body
LE: loop exit
PB: predicated region body
PF: predicated region fallthrough
CT: control target
= control target key end

     0   :  { %11 = vsyncpa [#allocation3], 0  ;;  %s670_s0 = inlined_call_operand.hbm [shape: f32[16,32], index: 0, kind: input, shape index: {}]   ;;  %s671_s1 = inlined_call_operand.hbm [shape: f32[32,8], index: 1, kind: input, shape index: {}]   ;;  %s672_s2 = inlined_call_operand.hbm [shape: f32[1,8], index: 2, kind: input, shape index: {}]   ;;  %s673_s3 = inlined_call_operand.hbm [shape: f32[8,32], index: 3, kind: input, shape index: {}]   ;;  %s674_s4 = inlined_call_operand.hbm [shape: f32[1,32], index: 4, kind: input, shape index: {}]   ;;  %s675_s5 = inlined_call_operand.hbm [shape: f32[1,32], index: 5, kind: input, shape index: {}]   ;;  %s676_s6 = inlined_call_operand.hbm [shape: f32[16,32], index: 6, kind: output, shape index: {}]  }
   0x1   :  { %12 = vsyncpa [#allocation6], 0 }
   0x2   :  { %13 = vsyncpa [#allocation9], 0 }
   0x3   :  { %14 = vsyncpa [#allocation12], 0 }
   0x4   :  { %15 = vsyncpa [#allocation4], 0  ;;  %s529_s21 = smov [#allocation5]   ;;  %s530_s23 = smov [#allocation8]  }
   0x5   :  { %s33_s22 = sshll.u32 %s529_s21, 4  ;;  %s56_s24 = sshll.u32 %s530_s23, 4  ;;  %s34_s22 = int_to_ptr.vmem [resolvable:$true] %s33_s22  ;;  %s57_s24 = int_to_ptr.vmem [resolvable:$true] %s56_s24 }
   0x6   :  { %s365_s27 = scalar_lea.hbm %s671_s1, 512 }
   0x7   :  { %p366_p0 = scmp.ne.s32.totalorder %s671_s1, %s365_s27  ;;  %p369_p1 = scmp.lt.u32.totalorder %s365_s27, %s671_s1 }
   0x9   :  { %p371_p2 = pnand %p369_p1, %p366_p0 }
   0xb   :  { %374 = shalt.err (!%p371_p2)
}
   0xc   :  { %s375_s8 = scalar_lea.vmem %s34_s22, 512  ;;  %p380_p4 = scmp.lt.s32.totalorder %s34_s22, %s34_s22 }
   0xd   :  { %p376_p3 = scmp.ne.s32.totalorder %s34_s22, %s375_s8  ;;  %p381_p5 = scmp.lt.s32.totalorder %s375_s8, %s375_s8 }
   0xf   :  { %p382_p6 = por %p381_p5, %p380_p4 }
  0x11   :  { %p383_p7 = pnand %p382_p6, %p376_p3 }
  0x13   :  { %386 = shalt.err (!%p383_p7)
}
  0x14   :  { %s531_s9 = smov 128   ;;  %s532_s10 = smov 8  }
  0x15   :  { %39 = dma.hbm_to_vmem [thread:$0]  %s671_s1, 512, %s34_s22, [#allocation6], %s531_s9, %s531_s9, %s532_s10  }
  0x16   :  { %s387_s15 = scalar_lea.hbm %s673_s3, 128 }
  0x17   :  { %p388_p8 = scmp.ne.s32.totalorder %s673_s3, %s387_s15  ;;  %p391_p9 = scmp.lt.u32.totalorder %s387_s15, %s673_s3 }
  0x19   :  { %p393_p10 = pnand %p391_p9, %p388_p8 }
  0x1b   :  { %396 = shalt.err (!%p393_p10)
}
  0x1c   :  { %s397_s20 = scalar_lea.vmem %s57_s24, 128  ;;  %p402_p12 = scmp.lt.s32.totalorder %s57_s24, %s57_s24 }
  0x1d   :  { %p398_p11 = scmp.ne.s32.totalorder %s57_s24, %s397_s20  ;;  %p403_p13 = scmp.lt.s32.totalorder %s397_s20, %s397_s20 }
  0x1f   :  { %p404_p0 = por %p403_p13, %p402_p12 }
  0x21   :  { %p405_p1 = pnand %p404_p0, %p398_p11 }
  0x23   :  { %408 = shalt.err (!%p405_p1)
}
  0x24   :  { %59 = dma.hbm_to_vmem [thread:$0]  %s673_s3, 128, %s57_s24, [#allocation9]  }
  0x25   :  { %s533_s22 = smov [#allocation2]   ;;  %s534_s25 = smov [#allocation7]  }
  0x26   :  { %s21_s23 = sshll.u32 %s533_s22, 4  ;;  %s46_s26 = sshll.u32 %s534_s25, 4  ;;  %s22_s23 = int_to_ptr.vmem [resolvable:$true] %s21_s23  ;;  %s47_s26 = int_to_ptr.vmem [resolvable:$true] %s46_s26 }
  0x27   :  { %s409_s29 = scalar_lea.hbm %s670_s0, 256 }
  0x28   :  { %p410_p2 = scmp.ne.s32.totalorder %s670_s0, %s409_s29  ;;  %p413_p3 = scmp.lt.u32.totalorder %s409_s29, %s670_s0 }
  0x2a   :  { %p415_p4 = pnand %p413_p3, %p410_p2 }
  0x2c   :  { %418 = shalt.err (!%p415_p4)
}
  0x2d   :  { %s419_s3 = scalar_lea.vmem %s22_s23, 256  ;;  %p424_p6 = scmp.lt.s32.totalorder %s22_s23, %s22_s23 }
  0x2e   :  { %p420_p5 = scmp.ne.s32.totalorder %s22_s23, %s419_s3  ;;  %p425_p7 = scmp.lt.s32.totalorder %s419_s3, %s419_s3 }
  0x30   :  { %p426_p8 = por %p425_p7, %p424_p6 }
  0x32   :  { %p427_p9 = pnand %p426_p8, %p420_p5 }
  0x34   :  { %430 = shalt.err (!%p427_p9)
}
  0x35   :  { %27 = dma.hbm_to_vmem [thread:$0]  %s670_s0, 256, %s22_s23, [#allocation3], %s531_s9, %s531_s9, %s532_s10  }
  0x36   :  { %s431_s15 = scalar_lea.hbm %s672_s2, 16 }
  0x37   :  { %p432_p10 = scmp.ne.s32.totalorder %s672_s2, %s431_s15  ;;  %p435_p11 = scmp.lt.u32.totalorder %s431_s15, %s672_s2 }
  0x39   :  { %p437_p12 = pnand %p435_p11, %p432_p10 }
  0x3b   :  { %440 = shalt.err (!%p437_p12)
}
  0x3c   :  { %s441_s20 = scalar_lea.vmem %s47_s26, 16  ;;  %s445_s1 = scalar_lea.vmem %s47_s26, 32 }
  0x3d   :  { %p442_p13 = scmp.ne.s32.totalorder %s47_s26, %s441_s20  ;;  %p446_p0 = scmp.lt.s32.totalorder %s47_s26, %s47_s26 }
  0x3e   :  { %p447_p1 = scmp.lt.s32.totalorder %s445_s1, %s441_s20 }
  0x40   :  { %p448_p2 = por %p447_p1, %p446_p0 }
  0x42   :  { %p449_p3 = pnand %p448_p2, %p442_p13 }
  0x44   :  { %452 = shalt.err (!%p449_p3)
}
  0x45   :  { %49 = dma.hbm_to_vmem [thread:$0]  %s672_s2, 16, %s47_s26, [#allocation6]  }
  0x46   :  { %s535_s22 = smov [#allocation10]   ;;  %s536_s25 = smov [#allocation11]  }
  0x47   :  { %s66_s23 = sshll.u32 %s535_s22, 4  ;;  %s76_s27 = sshll.u32 %s536_s25, 4  ;;  %s67_s23 = int_to_ptr.vmem [resolvable:$true] %s66_s23  ;;  %s77_s27 = int_to_ptr.vmem [resolvable:$true] %s76_s27 }
  0x48   :  { %s453_s30 = scalar_lea.hbm %s674_s4, 16 }
  0x49   :  { %p454_p4 = scmp.ne.s32.totalorder %s674_s4, %s453_s30  ;;  %p457_p5 = scmp.lt.u32.totalorder %s453_s30, %s674_s4 }
  0x4b   :  { %p459_p6 = pnand %p457_p5, %p454_p4 }
  0x4d   :  { %462 = shalt.err (!%p459_p6)
}
  0x4e   :  { %s463_s2 = scalar_lea.vmem %s67_s23, 16  ;;  %s467_s26 = scalar_lea.vmem %s67_s23, 32 }
  0x4f   :  { %p464_p7 = scmp.ne.s32.totalorder %s67_s23, %s463_s2  ;;  %p468_p8 = scmp.lt.s32.totalorder %s67_s23, %s67_s23 }
  0x50   :  { %p469_p9 = scmp.lt.s32.totalorder %s467_s26, %s463_s2 }
  0x52   :  { %p470_p10 = por %p469_p9, %p468_p8 }
  0x54   :  { %p471_p11 = pnand %p470_p10, %p464_p7 }
  0x56   :  { %474 = shalt.err (!%p471_p11)
}
  0x57   :  { %69 = dma.hbm_to_vmem [thread:$0]  %s674_s4, 16, %s67_s23, [#allocation9]  }
  0x58   :  { %s475_s15 = scalar_lea.hbm %s675_s5, 16 }
  0x59   :  { %p476_p12 = scmp.ne.s32.totalorder %s675_s5, %s475_s15  ;;  %p479_p13 = scmp.lt.u32.totalorder %s475_s15, %s675_s5 }
  0x5b   :  { %p481_p0 = pnand %p479_p13, %p476_p12 }
  0x5d   :  { %484 = shalt.err (!%p481_p0)
}
  0x5e   :  { %s485_s20 = scalar_lea.vmem %s77_s27, 16  ;;  %s489_s1 = scalar_lea.vmem %s77_s27, 32 }
  0x5f   :  { %p486_p1 = scmp.ne.s32.totalorder %s77_s27, %s485_s20  ;;  %p490_p2 = scmp.lt.s32.totalorder %s77_s27, %s77_s27 }
  0x60   :  { %p491_p3 = scmp.lt.s32.totalorder %s489_s1, %s485_s20 }
  0x62   :  { %p492_p4 = por %p491_p3, %p490_p2 }
  0x64   :  { %p493_p5 = pnand %p492_p4, %p486_p1 }
  0x66   :  { %496 = shalt.err (!%p493_p5)
}
  0x67   :  { %79 = dma.hbm_to_vmem [thread:$0]  %s675_s5, 16, %s77_s27, [#allocation12]  }
  0x68   :  { %519 = dma.done.wait [#allocation3], 256  }
  0x69   :  { %520 = vsyncadd [#allocation3], 4294967040 }
  0x6a   :  { %521 = dma.done.wait [#allocation6], 528  }
  0x6b   :  { %522 = vsyncadd [#allocation6], 4294966768 }
  0x6c   :  { %523 = dma.done.wait [#allocation9], 144  }
  0x6d   :  { %524 = vsyncadd [#allocation9], 4294967152 }
  0x6e   :  { %525 = dma.done.wait [#allocation12], 16  }
  0x6f   :  { %526 = vsyncadd [#allocation12], 4294967280  ;;  %vm111_vm0 = vcmask 261120   ;;  %v100_v0 = vld [vmem:[#allocation5] sm:$0xff]  ;;  %v101_v1 = vld [vmem:[#allocation5 + $0x8] sm:$0xff]  ;;  %vm203_vm1 = vcmask 64512  }
  0x70   :  { %v102_v2 = vld [vmem:[#allocation5 + $0x10] sm:$0xff]  ;;  %v348_v3 = vpack.c.bf16 %v101_v1, %v100_v0  ;;  %v103_v4 = vld [vmem:[#allocation5 + $0x18] sm:$0xff]  ;;  %v195_v8 = vld [vmem:[#allocation8] sm:$0xff]  ;;  %s537_s5 = smov [#allocation13]  }
  0x71   :  { %v98_v5 = vld [vmem:[#allocation2] sm:$0xff]  ;;  %v352_v6 = vpack.c.bf16 %v103_v4, %v102_v2  ;;  %v99_v7 = vld [vmem:[#allocation2 + $0x8] sm:$0xff]  ;;  %343 = vmatprep.subr.mxu1 %v195_v8  ;;  %v316_v9 = vld [vmem:[#allocation7] ss:$0 sm:$0xff]  ;;  %s301_s21 = sshll.u32 %s537_s5, 4  ;;  %s302_s21 = int_to_ptr.vmem [resolvable:$true] %s301_s21 }
  0x72   :  { %340 = vmatprep.mubr.msk.f32.mxu0 %vm111_vm0, %v98_v5  ;;  %349 = vmatprep.subr.bf16.mxu0 %v348_v3  ;;  %v319_v16 = vld [vmem:[#allocation10] ss:$0 sm:$0xff]  ;;  %v322_v18 = vld [vmem:[#allocation11] ss:$0 sm:$0xff]  ;;  %s497_s22 = scalar_lea.vmem %s302_s21, 256  ;;  %p502_p7 = scmp.lt.s32.totalorder %s302_s21, %s302_s21 }
  0x73   :  { %351 = vmatpush3.bf16.msra.mxu0 %v348_v3  ;;  %344 = vmatpush3.msra.mxu1 %v195_v8  ;;  %p498_p6 = scmp.ne.s32.totalorder %s302_s21, %s497_s22  ;;  %p503_p8 = scmp.lt.s32.totalorder %s497_s22, %s497_s22 }
  0x74   :  { %353 = vmatprep.subr.bf16.mxu0 %v352_v6 }
  0x75   :  { %p504_p9 = por %p503_p8, %p502_p7 }
  0x77   :  { %355 = vmatpush3.bf16.msra.mxu0 %v352_v6  ;;  %p505_p10 = pnand %p504_p9, %p498_p6 }
  0x7a   :  { %341 = vmatmul.mubr.msk.f32.vlgmr.msra.gmra.mrb[0].mxu0 %vm111_vm0, %v99_v7 }
 0x14d   :  { %v342_v10 = vpop.f32.mrb[0].mxu0 }
 0x14e   :  { %v190_v11 = vadd.f32 %v342_v10, %v316_v9  ;;  %v184_v12 = vpop.f32.mrb[1].mxu0 }
 0x14f   :  { %v185_v13 = vadd.f32 %v316_v9, %v184_v12 }
 0x150   :  { %v194_v15 = vmax.f32 %v190_v11, 0.0 }
 0x151   :  { %v193_v14 = vmax.f32 %v185_v13, 0.0 }
 0x153   :  { %345 = vmatprep.mubr.msk.f32.mxu1 %vm203_vm1, %v193_v14 }
 0x154   :  { %346 = vmatmul.mubr.msk.f32.vlgmr.msra.gmra.mrb[0].mxu1 %vm203_vm1, %v194_v15 }
 0x227   :  { %v347_v17 = vpop.f32.mrb[0].mxu1 }
 0x228   :  { %v282_v19 = vadd.f32 %v347_v17, %v319_v16  ;;  %v276_v20 = vpop.f32.mrb[1].mxu1 }
 0x229   :  { %v277_v21 = vadd.f32 %v319_v16, %v276_v20 }
 0x22a   :  { %v293_v22 = vmul.f32 %v322_v18, %v282_v19 }
 0x22b   :  { %v292_v23 = vmul.f32 %v322_v18, %v277_v21 }
 0x22c   :  { %295 = vst.msk [vmem:[#allocation13 + $0x8] sm:$0xff] %vm111_vm0, %v293_v22 }
 0x22d   :  { %294 = vst.msk [vmem:[#allocation13] sm:$0xff] %vm111_vm0, %v292_v23 }
 0x22e   :  { %508 = shalt.err (!%p505_p10)
}
 0x22f   :  { %s509_s27 = scalar_lea.hbm %s676_s6, 256 }
 0x230   :  { %p510_p11 = scmp.ne.s32.totalorder %s676_s6, %s509_s27  ;;  %p513_p12 = scmp.lt.u32.totalorder %s509_s27, %s676_s6 }
 0x232   :  { %p515_p13 = pnand %p513_p12, %p510_p11 }
 0x234   :  { %518 = shalt.err (!%p515_p13)
}
 0x235   :  { %307 = dma.vmem_to_hbm [thread:$0]  %s302_s21, 256, %s676_s6, [#allocation4], %s531_s9, %s531_s9, %s532_s10  }
 0x236   :  { %527 = dma.done.wait [#allocation4], 256  }
 0x237   :  { %528 = vsyncadd [#allocation4], 4294967040 }
 0x238   :  { %311 = vsyncpa [#allocation3], 1 }
 0x239   :  { %312 = vsyncpa [#allocation6], 1 }
 0x23a   :  { %313 = vsyncpa [#allocation9], 1 }
 0x23b   :  { %314 = vsyncpa [#allocation12], 1 }
 0x23c   :  { %315 = vsyncpa [#allocation4], 1 }

// kernel: tpu_custom_call.1
= control target key start
LH: loop header
LB: loop body
LE: loop exit
PB: predicated region body
PF: predicated region fallthrough
CT: control target
= control target key end

     0   :  { %11 = vsyncpa [#allocation3], 0  ;;  %s670_s0 = inlined_call_operand.hbm [shape: f32[16,32], index: 0, kind: input, shape index: {}]   ;;  %s671_s1 = inlined_call_operand.hbm [shape: f32[32,8], index: 1, kind: input, shape index: {}]   ;;  %s672_s2 = inlined_call_operand.hbm [shape: f32[1,8], index: 2, kind: input, shape index: {}]   ;;  %s673_s3 = inlined_call_operand.hbm [shape: f32[8,32], index: 3, kind: input, shape index: {}]   ;;  %s674_s4 = inlined_call_operand.hbm [shape: f32[1,32], index: 4, kind: input, shape index: {}]   ;;  %s675_s5 = inlined_call_operand.hbm [shape: f32[1,32], index: 5, kind: input, shape index: {}]   ;;  %s676_s6 = inlined_call_operand.hbm [shape: f32[16,32], index: 6, kind: output, shape index: {}]  }
   0x1   :  { %12 = vsyncpa [#allocation6], 0 }
   0x2   :  { %13 = vsyncpa [#allocation9], 0 }
   0x3   :  { %14 = vsyncpa [#allocation12], 0 }
   0x4   :  { %15 = vsyncpa [#allocation4], 0  ;;  %s529_s21 = smov [#allocation5]   ;;  %s530_s23 = smov [#allocation8]  }
   0x5   :  { %s33_s22 = sshll.u32 %s529_s21, 4  ;;  %s56_s24 = sshll.u32 %s530_s23, 4  ;;  %s34_s22 = int_to_ptr.vmem [resolvable:$true] %s33_s22  ;;  %s57_s24 = int_to_ptr.vmem [resolvable:$true] %s56_s24 }
   0x6   :  { %s365_s27 = scalar_lea.hbm %s671_s1, 512 }
   0x7   :  { %p366_p0 = scmp.ne.s32.totalorder %s671_s1, %s365_s27  ;;  %p369_p1 = scmp.lt.u32.totalorder %s365_s27, %s671_s1 }
   0x9   :  { %p371_p2 = pnand %p369_p1, %p366_p0 }
   0xb   :  { %374 = shalt.err (!%p371_p2)
}
   0xc   :  { %s375_s8 = scalar_lea.vmem %s34_s22, 512  ;;  %p380_p4 = scmp.lt.s32.totalorder %s34_s22, %s34_s22 }
   0xd   :  { %p376_p3 = scmp.ne.s32.totalorder %s34_s22, %s375_s8  ;;  %p381_p5 = scmp.lt.s32.totalorder %s375_s8, %s375_s8 }
   0xf   :  { %p382_p6 = por %p381_p5, %p380_p4 }
  0x11   :  { %p383_p7 = pnand %p382_p6, %p376_p3 }
  0x13   :  { %386 = shalt.err (!%p383_p7)
}
  0x14   :  { %s531_s9 = smov 128   ;;  %s532_s10 = smov 8  }
  0x15   :  { %39 = dma.hbm_to_vmem [thread:$0]  %s671_s1, 512, %s34_s22, [#allocation6], %s531_s9, %s531_s9, %s532_s10  }
  0x16   :  { %s387_s15 = scalar_lea.hbm %s673_s3, 128 }
  0x17   :  { %p388_p8 = scmp.ne.s32.totalorder %s673_s3, %s387_s15  ;;  %p391_p9 = scmp.lt.u32.totalorder %s387_s15, %s673_s3 }
  0x19   :  { %p393_p10 = pnand %p391_p9, %p388_p8 }
  0x1b   :  { %396 = shalt.err (!%p393_p10)
}
  0x1c   :  { %s397_s20 = scalar_lea.vmem %s57_s24, 128  ;;  %p402_p12 = scmp.lt.s32.totalorder %s57_s24, %s57_s24 }
  0x1d   :  { %p398_p11 = scmp.ne.s32.totalorder %s57_s24, %s397_s20  ;;  %p403_p13 = scmp.lt.s32.totalorder %s397_s20, %s397_s20 }
  0x1f   :  { %p404_p0 = por %p403_p13, %p402_p12 }
  0x21   :  { %p405_p1 = pnand %p404_p0, %p398_p11 }
  0x23   :  { %408 = shalt.err (!%p405_p1)
}
  0x24   :  { %59 = dma.hbm_to_vmem [thread:$0]  %s673_s3, 128, %s57_s24, [#allocation9]  }
  0x25   :  { %s533_s22 = smov [#allocation2]   ;;  %s534_s25 = smov [#allocation7]  }
  0x26   :  { %s21_s23 = sshll.u32 %s533_s22, 4  ;;  %s46_s26 = sshll.u32 %s534_s25, 4  ;;  %s22_s23 = int_to_ptr.vmem [resolvable:$true] %s21_s23  ;;  %s47_s26 = int_to_ptr.vmem [resolvable:$true] %s46_s26 }
  0x27   :  { %s409_s29 = scalar_lea.hbm %s670_s0, 256 }
  0x28   :  { %p410_p2 = scmp.ne.s32.totalorder %s670_s0, %s409_s29  ;;  %p413_p3 = scmp.lt.u32.totalorder %s409_s29, %s670_s0 }
  0x2a   :  { %p415_p4 = pnand %p413_p3, %p410_p2 }
  0x2c   :  { %418 = shalt.err (!%p415_p4)
}
  0x2d   :  { %s419_s3 = scalar_lea.vmem %s22_s23, 256  ;;  %p424_p6 = scmp.lt.s32.totalorder %s22_s23, %s22_s23 }
  0x2e   :  { %p420_p5 = scmp.ne.s32.totalorder %s22_s23, %s419_s3  ;;  %p425_p7 = scmp.lt.s32.totalorder %s419_s3, %s419_s3 }
  0x30   :  { %p426_p8 = por %p425_p7, %p424_p6 }
  0x32   :  { %p427_p9 = pnand %p426_p8, %p420_p5 }
  0x34   :  { %430 = shalt.err (!%p427_p9)
}
  0x35   :  { %27 = dma.hbm_to_vmem [thread:$0]  %s670_s0, 256, %s22_s23, [#allocation3], %s531_s9, %s531_s9, %s532_s10  }
  0x36   :  { %s431_s15 = scalar_lea.hbm %s672_s2, 16 }
  0x37   :  { %p432_p10 = scmp.ne.s32.totalorder %s672_s2, %s431_s15  ;;  %p435_p11 = scmp.lt.u32.totalorder %s431_s15, %s672_s2 }
  0x39   :  { %p437_p12 = pnand %p435_p11, %p432_p10 }
  0x3b   :  { %440 = shalt.err (!%p437_p12)
}
  0x3c   :  { %s441_s20 = scalar_lea.vmem %s47_s26, 16  ;;  %s445_s1 = scalar_lea.vmem %s47_s26, 32 }
  0x3d   :  { %p442_p13 = scmp.ne.s32.totalorder %s47_s26, %s441_s20  ;;  %p446_p0 = scmp.lt.s32.totalorder %s47_s26, %s47_s26 }
  0x3e   :  { %p447_p1 = scmp.lt.s32.totalorder %s445_s1, %s441_s20 }
  0x40   :  { %p448_p2 = por %p447_p1, %p446_p0 }
  0x42   :  { %p449_p3 = pnand %p448_p2, %p442_p13 }
  0x44   :  { %452 = shalt.err (!%p449_p3)
}
  0x45   :  { %49 = dma.hbm_to_vmem [thread:$0]  %s672_s2, 16, %s47_s26, [#allocation6]  }
  0x46   :  { %s535_s22 = smov [#allocation10]   ;;  %s536_s25 = smov [#allocation11]  }
  0x47   :  { %s66_s23 = sshll.u32 %s535_s22, 4  ;;  %s76_s27 = sshll.u32 %s536_s25, 4  ;;  %s67_s23 = int_to_ptr.vmem [resolvable:$true] %s66_s23  ;;  %s77_s27 = int_to_ptr.vmem [resolvable:$true] %s76_s27 }
  0x48   :  { %s453_s30 = scalar_lea.hbm %s674_s4, 16 }
  0x49   :  { %p454_p4 = scmp.ne.s32.totalorder %s674_s4, %s453_s30  ;;  %p457_p5 = scmp.lt.u32.totalorder %s453_s30, %s674_s4 }
  0x4b   :  { %p459_p6 = pnand %p457_p5, %p454_p4 }
  0x4d   :  { %462 = shalt.err (!%p459_p6)
}
  0x4e   :  { %s463_s2 = scalar_lea.vmem %s67_s23, 16  ;;  %s467_s26 = scalar_lea.vmem %s67_s23, 32 }
  0x4f   :  { %p464_p7 = scmp.ne.s32.totalorder %s67_s23, %s463_s2  ;;  %p468_p8 = scmp.lt.s32.totalorder %s67_s23, %s67_s23 }
  0x50   :  { %p469_p9 = scmp.lt.s32.totalorder %s467_s26, %s463_s2 }
  0x52   :  { %p470_p10 = por %p469_p9, %p468_p8 }
  0x54   :  { %p471_p11 = pnand %p470_p10, %p464_p7 }
  0x56   :  { %474 = shalt.err (!%p471_p11)
}
  0x57   :  { %69 = dma.hbm_to_vmem [thread:$0]  %s674_s4, 16, %s67_s23, [#allocation9]  }
  0x58   :  { %s475_s15 = scalar_lea.hbm %s675_s5, 16 }
  0x59   :  { %p476_p12 = scmp.ne.s32.totalorder %s675_s5, %s475_s15  ;;  %p479_p13 = scmp.lt.u32.totalorder %s475_s15, %s675_s5 }
  0x5b   :  { %p481_p0 = pnand %p479_p13, %p476_p12 }
  0x5d   :  { %484 = shalt.err (!%p481_p0)
}
  0x5e   :  { %s485_s20 = scalar_lea.vmem %s77_s27, 16  ;;  %s489_s1 = scalar_lea.vmem %s77_s27, 32 }
  0x5f   :  { %p486_p1 = scmp.ne.s32.totalorder %s77_s27, %s485_s20  ;;  %p490_p2 = scmp.lt.s32.totalorder %s77_s27, %s77_s27 }
  0x60   :  { %p491_p3 = scmp.lt.s32.totalorder %s489_s1, %s485_s20 }
  0x62   :  { %p492_p4 = por %p491_p3, %p490_p2 }
  0x64   :  { %p493_p5 = pnand %p492_p4, %p486_p1 }
  0x66   :  { %496 = shalt.err (!%p493_p5)
}
  0x67   :  { %79 = dma.hbm_to_vmem [thread:$0]  %s675_s5, 16, %s77_s27, [#allocation12]  }
  0x68   :  { %519 = dma.done.wait [#allocation3], 256  }
  0x69   :  { %520 = vsyncadd [#allocation3], 4294967040 }
  0x6a   :  { %521 = dma.done.wait [#allocation6], 528  }
  0x6b   :  { %522 = vsyncadd [#allocation6], 4294966768 }
  0x6c   :  { %523 = dma.done.wait [#allocation9], 144  }
  0x6d   :  { %524 = vsyncadd [#allocation9], 4294967152 }
  0x6e   :  { %525 = dma.done.wait [#allocation12], 16  }
  0x6f   :  { %526 = vsyncadd [#allocation12], 4294967280  ;;  %vm111_vm0 = vcmask 261120   ;;  %v100_v0 = vld [vmem:[#allocation5] sm:$0xff]  ;;  %v101_v1 = vld [vmem:[#allocation5 + $0x8] sm:$0xff]  ;;  %vm203_vm1 = vcmask 64512  }
  0x70   :  { %v102_v2 = vld [vmem:[#allocation5 + $0x10] sm:$0xff]  ;;  %v348_v3 = vpack.c.bf16 %v101_v1, %v100_v0  ;;  %v103_v4 = vld [vmem:[#allocation5 + $0x18] sm:$0xff]  ;;  %v195_v8 = vld [vmem:[#allocation8] sm:$0xff]  ;;  %s537_s5 = smov [#allocation13]  }
  0x71   :  { %v98_v5 = vld [vmem:[#allocation2] sm:$0xff]  ;;  %v352_v6 = vpack.c.bf16 %v103_v4, %v102_v2  ;;  %v99_v7 = vld [vmem:[#allocation2 + $0x8] sm:$0xff]  ;;  %343 = vmatprep.subr.mxu1 %v195_v8  ;;  %v316_v9 = vld [vmem:[#allocation7] ss:$0 sm:$0xff]  ;;  %s301_s21 = sshll.u32 %s537_s5, 4  ;;  %s302_s21 = int_to_ptr.vmem [resolvable:$true] %s301_s21 }
  0x72   :  { %340 = vmatprep.mubr.msk.f32.mxu0 %vm111_vm0, %v98_v5  ;;  %349 = vmatprep.subr.bf16.mxu0 %v348_v3  ;;  %v319_v16 = vld [vmem:[#allocation10] ss:$0 sm:$0xff]  ;;  %v322_v18 = vld [vmem:[#allocation11] ss:$0 sm:$0xff]  ;;  %s497_s22 = scalar_lea.vmem %s302_s21, 256  ;;  %p502_p7 = scmp.lt.s32.totalorder %s302_s21, %s302_s21 }
  0x73   :  { %351 = vmatpush3.bf16.msra.mxu0 %v348_v3  ;;  %344 = vmatpush3.msra.mxu1 %v195_v8  ;;  %p498_p6 = scmp.ne.s32.totalorder %s302_s21, %s497_s22  ;;  %p503_p8 = scmp.lt.s32.totalorder %s497_s22, %s497_s22 }
  0x74   :  { %353 = vmatprep.subr.bf16.mxu0 %v352_v6 }
  0x75   :  { %p504_p9 = por %p503_p8, %p502_p7 }
  0x77   :  { %355 = vmatpush3.bf16.msra.mxu0 %v352_v6  ;;  %p505_p10 = pnand %p504_p9, %p498_p6 }
  0x7a   :  { %341 = vmatmul.mubr.msk.f32.vlgmr.msra.gmra.mrb[0].mxu0 %vm111_vm0, %v99_v7 }
 0x14d   :  { %v342_v10 = vpop.f32.mrb[0].mxu0 }
 0x14e   :  { %v190_v11 = vadd.f32 %v342_v10, %v316_v9  ;;  %v184_v12 = vpop.f32.mrb[1].mxu0 }
 0x14f   :  { %v185_v13 = vadd.f32 %v316_v9, %v184_v12 }
 0x150   :  { %v194_v15 = vmax.f32 %v190_v11, 0.0 }
 0x151   :  { %v193_v14 = vmax.f32 %v185_v13, 0.0 }
 0x153   :  { %345 = vmatprep.mubr.msk.f32.mxu1 %vm203_vm1, %v193_v14 }
 0x154   :  { %346 = vmatmul.mubr.msk.f32.vlgmr.msra.gmra.mrb[0].mxu1 %vm203_vm1, %v194_v15 }
 0x227   :  { %v347_v17 = vpop.f32.mrb[0].mxu1 }
 0x228   :  { %v282_v19 = vadd.f32 %v347_v17, %v319_v16  ;;  %v276_v20 = vpop.f32.mrb[1].mxu1 }
 0x229   :  { %v277_v21 = vadd.f32 %v319_v16, %v276_v20 }
 0x22a   :  { %v293_v22 = vmul.f32 %v322_v18, %v282_v19 }
 0x22b   :  { %v292_v23 = vmul.f32 %v322_v18, %v277_v21 }
 0x22c   :  { %295 = vst.msk [vmem:[#allocation13 + $0x8] sm:$0xff] %vm111_vm0, %v293_v22 }
 0x22d   :  { %294 = vst.msk [vmem:[#allocation13] sm:$0xff] %vm111_vm0, %v292_v23 }
 0x22e   :  { %508 = shalt.err (!%p505_p10)
}
 0x22f   :  { %s509_s27 = scalar_lea.hbm %s676_s6, 256 }
 0x230   :  { %p510_p11 = scmp.ne.s32.totalorder %s676_s6, %s509_s27  ;;  %p513_p12 = scmp.lt.u32.totalorder %s509_s27, %s676_s6 }
 0x232   :  { %p515_p13 = pnand %p513_p12, %p510_p11 }
 0x234   :  { %518 = shalt.err (!%p515_p13)
}
 0x235   :  { %307 = dma.vmem_to_hbm [thread:$0]  %s302_s21, 256, %s676_s6, [#allocation4], %s531_s9, %s531_s9, %s532_s10  }
 0x236   :  { %527 = dma.done.wait [#allocation4], 256  }
 0x237   :  { %528 = vsyncadd [#allocation4], 4294967040 }
 0x238   :  { %311 = vsyncpa [#allocation3], 1 }
 0x239   :  { %312 = vsyncpa [#allocation6], 1 }
 0x23a   :  { %313 = vsyncpa [#allocation9], 1 }
 0x23b   :  { %314 = vsyncpa [#allocation12], 1 }
 0x23c   :  { %315 = vsyncpa [#allocation4], 1 }

</bundles_post_ra>
